<compile_context>
chip_gen: v7x
topology: tpu7x:2x2x1
jax: 0.10.0
libtpu: 0.0.40
codegen_flags: <defaults>
</compile_context>

<pallas_src>
import numpy as np
import jax
import jax.numpy as jnp
from jax import lax
from jax.experimental import pallas as pl
from jax.experimental.pallas import tpu as pltpu


# -----------------------------------------------------------------------------
# Pallas kernel
# -----------------------------------------------------------------------------
def _make_bottleneck_kernel(bp, bps, planes, dgate, dilation):
    cb = bp + 2 * bps                      # total bottleneck width (64 here)
    dils = (dilation, dilation + 1, dilation + 2)
    widths = (bp, bps, bps)

    def kernel(x_ref, w1_ref, w2_ref, w3_ref, wg1_ref, wg2_ref, bn_ref, out_ref):
        f32 = jnp.float32
        bf16 = jnp.bfloat16
        x = x_ref[...]                     # (L, Cin) bf16 - one batch segment
        L = x.shape[0]

        def bn(h, lo, hi, relu=True):
            v = h * bn_ref[0:1, lo:hi] + bn_ref[1:2, lo:hi]
            return jnp.maximum(v, 0.0) if relu else v

        # ---- fused 1x1 convs: [conv1 | conv1_d | conv1_u | shortcut] --------
        h_all = jnp.dot(x, w1_ref[...], preferred_element_type=f32)  # (L, cb+planes)
        residual = h_all[:, cb:cb + planes]
        hb = bn(h_all[:, 0:cb], 0, cb)      # (L, cb) f32, [main | down | up]

        # ---- grouped 3-tap dilated convs -------------------------------------
        # Shifted copies via XLU sublane rolls; per-branch dilation + "same"
        # zero padding via in-kernel iota masks (no mask slab in HBM).  Each
        # grid step covers exactly one batch segment, so rolls never leak
        # across batches.
        row = lax.broadcasted_iota(jnp.int32, (L, cb), 0)
        col = lax.broadcasted_iota(jnp.int32, (L, cb), 1)
        minus = jnp.zeros((L, cb), f32)     # row r holds hb[r - d_branch]
        plus = jnp.zeros((L, cb), f32)      # row r holds hb[r + d_branch]
        lo = 0
        for d, w in zip(dils, widths):
            branch = (col >= lo) & (col < lo + w)
            m_m = ((row >= d) & branch).astype(f32)
            m_p = ((row < L - d) & branch).astype(f32)
            minus = minus + pltpu.roll(hb, shift=d, axis=0) * m_m
            plus = plus + pltpu.roll(hb, shift=(L - d) % L, axis=0) * m_p
            lo += w

        # single fused tap matmul: (L, 3*cb) @ (3*cb, cb)
        taps = jnp.concatenate([minus, hb, plus], axis=1).astype(bf16)
        y = jnp.dot(taps, w2_ref[...], preferred_element_type=f32)
        y = bn(y, cb, 2 * cb)

        # ---- fused conv3 (block diagonal) -> [out_m | out_d | out_u] ---------
        out3 = jnp.dot(y.astype(bf16), w3_ref[...], preferred_element_type=f32)

        # ---- gate: per-batch adaptive avg-pool + fc1 + fc2 + softmax ---------
        u = (out3[:, 0:planes] + out3[:, planes:2 * planes]
             + out3[:, 2 * planes:3 * planes])
        s = jnp.mean(u, axis=0, keepdims=True)                       # (1, planes)
        z = jnp.dot(s, wg1_ref[...], preferred_element_type=f32)     # (1, dgate)
        z = bn(z, 2 * cb + planes, 2 * cb + planes + dgate)
        logits = jnp.dot(z, wg2_ref[...], preferred_element_type=f32)  # (1, 3*planes)
        l0 = logits[:, 0:planes]
        l1 = logits[:, planes:2 * planes]
        l2 = logits[:, 2 * planes:3 * planes]
        m = jnp.maximum(jnp.maximum(l0, l1), l2)
        e0 = jnp.exp(l0 - m)
        e1 = jnp.exp(l1 - m)
        e2 = jnp.exp(l2 - m)
        inv = pl.reciprocal(e0 + e1 + e2, approx=True)               # EUP slot
        gates = jnp.concatenate([e0 * inv, e1 * inv, e2 * inv], axis=1)  # (1, 3*planes)
        go = out3 * gates                     # single 192-lane VPU multiply
        gated = (go[:, 0:planes] + go[:, planes:2 * planes]
                 + go[:, 2 * planes:3 * planes])

        # ---- bn3 + residual (1x1 shortcut) + ReLU ----------------------------
        out = bn(gated, 2 * cb, 2 * cb + planes, relu=False) + residual
        out_ref[...] = jnp.maximum(out, 0.0)

    return kernel


def bottleneck_pallas(x_ncl, packed, *, bp, bps, planes, dgate, dilation=1):
    """x_ncl: (B, Cin, L) float32.  Returns (B, planes, L) float32."""
    B, Cin, L = x_ncl.shape
    # NCL -> (B*L, Cin): channels on the lane axis, batch folded into rows.
    # TODO(synk): when chaining blocks, keep activations in (B*L, C) layout and
    # drop the per-call NCL<->NLC transposes (they cost an extra HBM round trip).
    x2d = jnp.transpose(x_ncl, (0, 2, 1)).reshape(B * L, Cin).astype(jnp.bfloat16)

    w1, w2, w3, wg1, wg2, bn_all = packed
    kernel = _make_bottleneck_kernel(bp, bps, planes, dgate, dilation)

    def pinned(a):   # weight/BN slabs: full-shape block, same window every step
        return pl.BlockSpec(a.shape, lambda b: (0,) * a.ndim)

    out2d = pl.pallas_call(
        kernel,
        out_shape=jax.ShapeDtypeStruct((B * L, planes), jnp.float32),
        grid=(B,),
        in_specs=[pl.BlockSpec((L, Cin), lambda b: (b, 0)),
                  pinned(w1), pinned(w2), pinned(w3),
                  pinned(wg1), pinned(wg2), pinned(bn_all)],
        out_specs=pl.BlockSpec((L, planes), lambda b: (b, 0)),
        compiler_params=pltpu.CompilerParams(
            dimension_semantics=("parallel",)),
    )(x2d, w1, w2, w3, wg1, wg2, bn_all)
    return jnp.transpose(out2d.reshape(B, L, planes), (0, 2, 1))   # back to NCL


# -----------------------------------------------------------------------------
# Parameter setup (deterministic, synthetic) + packing into fused slabs
# -----------------------------------------------------------------------------
def expand_grouped(w, groups):
    """(Cout, Cin/groups, K) grouped conv weight -> (K, Cout, Cin) dense."""
    cout, cin_g, K = w.shape
    out_g = cout // groups
    blocks = jnp.transpose(w, (2, 0, 1)).reshape(K, groups, out_g, cin_g)
    rows = []
    for g in range(groups):
        left = jnp.zeros((K, out_g, g * cin_g), w.dtype)
        right = jnp.zeros((K, out_g, (groups - 1 - g) * cin_g), w.dtype)
        rows.append(jnp.concatenate([left, blocks[:, g], right], axis=2))
    return jnp.concatenate(rows, axis=1)


def init_params(key, inplanes, planes):
    cardinality = 32 // 2          # dsp=True
    bp = planes // 2
    card_s = cardinality // 2      # up_path=True
    bps = bp // 2
    d_gate = max(planes // 2, 32)

    keys = iter(jax.random.split(key, 64))

    def conv(cout, cin, k):
        return 0.1 * jax.random.normal(next(keys), (cout, cin, k), jnp.float32)

    def bn(c):
        gamma = 1.0 + 0.1 * jax.random.normal(next(keys), (c,), jnp.float32)
        beta = 0.1 * jax.random.normal(next(keys), (c,), jnp.float32)
        mean = 0.1 * jax.random.normal(next(keys), (c,), jnp.float32)
        var = 1.0 + 0.1 * jnp.abs(jax.random.normal(next(keys), (c,), jnp.float32))
        scale = gamma / jnp.sqrt(var + 1e-5)
        shift = beta - mean * scale
        return scale, shift

    del d_gate  # derived again below for clarity
    return dict(
        wsc=conv(planes, inplanes, 1),
        w1=conv(bp, inplanes, 1), bn1=bn(bp),
        w2=conv(bp, bp // cardinality, 3), bn2=bn(bp),
        w3=conv(planes, bp, 1),
        w1d=conv(bps, inplanes, 1), bn1d=bn(bps),
        w2d=conv(bps, bps // card_s, 3), bn2d=bn(bps),
        w3d=conv(planes, bps, 1),
        w1u=conv(bps, inplanes, 1), bn1u=bn(bps),
        w2u=conv(bps, bps // card_s, 3), bn2u=bn(bps),
        w3u=conv(planes, bps, 1),
        wg1=conv(max(planes // 2, 32), planes, 1), bng=bn(max(planes // 2, 32)),
        wg2=conv(planes * 3, max(planes // 2, 32), 1),
        bn3=bn(planes),
        cardinality=cardinality, card_s=card_s,
    )


def pack_inputs(p, planes):
    """Pack all weights/BN into 6 fused slabs for the kernel (bf16 matmul weights)."""
    bp = p['w1'].shape[0]
    bps = p['w1d'].shape[0]
    cb = bp + 2 * bps

    def t1(w):                     # (Cout, Cin, 1) -> (Cin, Cout), numpy
        return np.asarray(jnp.transpose(w[:, :, 0], (1, 0)), np.float32)

    # fused 1x1 weights: [conv1 | conv1_d | conv1_u | shortcut]  (Cin, cb+planes)
    w1all = np.concatenate([t1(p['w1']), t1(p['w1d']), t1(p['w1u']),
                            t1(p['wsc'])], axis=1)

    # per-tap dense block-diagonal conv2 weights, stacked on the K axis:
    # rows [0:cb]=tap k=0 (l-d), [cb:2cb]=k=1 (l), [2cb:3cb]=k=2 (l+d)
    def taps(w, groups):
        return np.asarray(jnp.transpose(expand_grouped(w, groups), (0, 2, 1)),
                          np.float32)
    Wm = taps(p['w2'], p['cardinality'])
    Wd = taps(p['w2d'], p['card_s'])
    Wu = taps(p['w2u'], p['card_s'])
    w2 = np.zeros((3, cb, cb), np.float32)
    for k in range(3):
        w2[k, 0:bp, 0:bp] = Wm[k]
        w2[k, bp:bp + bps, bp:bp + bps] = Wd[k]
        w2[k, bp + bps:cb, bp + bps:cb] = Wu[k]
    w2stack = w2.reshape(3 * cb, cb)

    # fused conv3 (block diagonal) -> [out_m | out_d | out_u]  (cb, 3*planes)
    w3 = np.zeros((cb, 3 * planes), np.float32)
    w3[0:bp, 0:planes] = t1(p['w3'])
    w3[bp:bp + bps, planes:2 * planes] = t1(p['w3d'])
    w3[bp + bps:cb, 2 * planes:3 * planes] = t1(p['w3u'])

    wg1 = t1(p['wg1'])             # (planes, dgate)
    wg2 = t1(p['wg2'])             # (dgate, 3*planes)

    # BN slab (inference-folded): columns [bn1(cb) | bn2(cb) | bn3(planes) | bng]
    def cat(*arrs):
        return np.concatenate([np.asarray(a, np.float32) for a in arrs])
    s1 = cat(p['bn1'][0], p['bn1d'][0], p['bn1u'][0])
    h1 = cat(p['bn1'][1], p['bn1d'][1], p['bn1u'][1])
    s2 = cat(p['bn2'][0], p['bn2d'][0], p['bn2u'][0])
    h2 = cat(p['bn2'][1], p['bn2d'][1], p['bn2u'][1])
    bn_all = np.stack([cat(s1, s2, p['bn3'][0], p['bng'][0]),
                       cat(h1, h2, p['bn3'][1], p['bng'][1])], axis=0)

    return [jnp.asarray(w1all, jnp.bfloat16),
            jnp.asarray(w2stack, jnp.bfloat16),
            jnp.asarray(w3, jnp.bfloat16),
            jnp.asarray(wg1, jnp.float32),
            jnp.asarray(wg2, jnp.float32),
            jnp.asarray(bn_all, jnp.float32)]


# -----------------------------------------------------------------------------
# Pure-JAX reference (NCL, lax convolutions) for verification
# -----------------------------------------------------------------------------
def _conv1d(x, w, groups=1, padding=0, dilation=1):
    return lax.conv_general_dilated(
        x, w, window_strides=(1,), padding=[(padding, padding)],
        rhs_dilation=(dilation,), dimension_numbers=('NCH', 'OIH', 'NCH'),
        feature_group_count=groups)


def _bnr(x, scale, shift):
    return jnp.maximum(x * scale[None, :, None] + shift[None, :, None], 0.0)


def ref_forward(x, p, dilation=1):
    B = x.shape[0]
    planes = p['wsc'].shape[0]
    residual = _conv1d(x, p['wsc'])

    def branch(w1, bn1, w2, groups, dil, bn2, w3):
        h = _conv1d(x, w1)
        h = _bnr(h, *bn1)
        h = _conv1d(h, w2, groups=groups, padding=dil, dilation=dil)
        h = _bnr(h, *bn2)
        return _conv1d(h, w3)

    out_m = branch(p['w1'], p['bn1'], p['w2'], p['cardinality'], dilation,
                   p['bn2'], p['w3'])
    out_d = branch(p['w1d'], p['bn1d'], p['w2d'], p['card_s'], dilation + 1,
                   p['bn2d'], p['w3d'])
    out_u = branch(p['w1u'], p['bn1u'], p['w2u'], p['card_s'], dilation + 2,
                   p['bn2u'], p['w3u'])

    U = out_m + out_d + out_u
    s = jnp.mean(U, axis=2, keepdims=True)              # AdaptiveAvgPool1d(1)
    z = _bnr(_conv1d(s, p['wg1']), *p['bng'])
    ab = _conv1d(z, p['wg2']).reshape(B, 3, planes)
    ab = jax.nn.softmax(ab, axis=1)
    a, b_, c = (ab[:, i, :, None] for i in range(3))
    out = out_m * a + out_d * b_ + out_u * c
    s3, sh3 = p['bn3']
    out = out * s3[None, :, None] + sh3[None, :, None]
    out = out + residual
    return jnp.maximum(out, 0.0)


# -----------------------------------------------------------------------------
if __name__ == "__main__":
    B, inplanes, planes, L = 2, 32, 64, 16
    dilation = 1
    key = jax.random.PRNGKey(0)
    kx, kp = jax.random.split(key)
    x = jax.random.normal(kx, (B, inplanes, L), jnp.float32)
    params = init_params(kp, inplanes, planes)

    bp = params['w1'].shape[0]
    bps = params['w1d'].shape[0]
    dgate = params['wg1'].shape[0]

    packed = pack_inputs(params, planes)
    out = bottleneck_pallas(x, packed, bp=bp, bps=bps, planes=planes,
                            dgate=dgate, dilation=dilation)
    out = jax.block_until_ready(out)
    assert out.shape == (B, planes, L)

    ref = jax.block_until_ready(ref_forward(x, params, dilation=dilation))
    err = float(jnp.max(jnp.abs(out - ref)))
    # bf16 matmul operands (f32 accumulation) + approx reciprocal -> 2e-2 tolerance
    if not np.allclose(np.asarray(out), np.asarray(ref), rtol=2e-2, atol=2e-2):
        raise AssertionError("Pallas/reference mismatch, max abs err = %g" % err)
    print("KERNEL_OK")
</pallas_src>

<mosaic_0001>
module attributes {stable_mosaic.version = 11 : i64} {
  func.func @kernel(%arg0: i32, %arg1: memref<16x32xbf16, #tpu.memory_space<vmem>>, %arg2: memref<32x128xbf16, #tpu.memory_space<vmem>>, %arg3: memref<192x64xbf16, #tpu.memory_space<vmem>>, %arg4: memref<64x192xbf16, #tpu.memory_space<vmem>>, %arg5: memref<64x32xf32, #tpu.memory_space<vmem>>, %arg6: memref<32x192xf32, #tpu.memory_space<vmem>>, %arg7: memref<2x224xf32, #tpu.memory_space<vmem>>, %arg8: memref<16x64xf32, #tpu.memory_space<vmem>>) attributes {dimension_semantics = [#tpu.dimension_semantics<parallel>], iteration_bounds = array<i64: 2>, scalar_prefetch = 0 : i64, scratch_operands = 0 : i64, tpu.core_type = #tpu.core_type<tc>, window_params = [{transform_indices = @transform_0, window_bounds = array<i64: 16, 32>}, {pipeline_mode = #tpu.pipeline_mode<synchronous>, transform_indices = @transform_1, window_bounds = array<i64: 32, 128>}, {pipeline_mode = #tpu.pipeline_mode<synchronous>, transform_indices = @transform_2, window_bounds = array<i64: 192, 64>}, {pipeline_mode = #tpu.pipeline_mode<synchronous>, transform_indices = @transform_3, window_bounds = array<i64: 64, 192>}, {pipeline_mode = #tpu.pipeline_mode<synchronous>, transform_indices = @transform_4, window_bounds = array<i64: 64, 32>}, {pipeline_mode = #tpu.pipeline_mode<synchronous>, transform_indices = @transform_5, window_bounds = array<i64: 32, 192>}, {pipeline_mode = #tpu.pipeline_mode<synchronous>, transform_indices = @transform_6, window_bounds = array<i64: 2, 224>}, {transform_indices = @transform_7, window_bounds = array<i64: 16, 64>}]} {
    %c0 = arith.constant 0 : index
    %c0_0 = arith.constant 0 : index
    %0 = vector.load %arg1[%c0, %c0_0] : memref<16x32xbf16, #tpu.memory_space<vmem>>, vector<16x32xbf16>
    %c0_1 = arith.constant 0 : index
    %c0_2 = arith.constant 0 : index
    %1 = vector.load %arg2[%c0_1, %c0_2] : memref<32x128xbf16, #tpu.memory_space<vmem>>, vector<32x128xbf16>
    %cst = arith.constant dense<0.000000e+00> : vector<16x128xf32>
    %2 = tpu.matmul %0, %1, %cst {dimension_numbers = #tpu.dot_dimension_numbers<[1], [0], [0], [1], [0, 0, 1, 1], [], []>} : vector<16x32xbf16>, vector<32x128xbf16>, vector<16x128xf32> -> vector<16x128xf32>
    %3 = vector.extract_strided_slice %2 {offsets = [0, 64], sizes = [16, 64], strides = [1, 1]} : vector<16x128xf32> to vector<16x64xf32>
    %4 = vector.extract_strided_slice %2 {offsets = [0, 0], sizes = [16, 64], strides = [1, 1]} : vector<16x128xf32> to vector<16x64xf32>
    %c0_3 = arith.constant 0 : index
    %c0_4 = arith.constant 0 : index
    %5 = vector.load %arg7[%c0_3, %c0_4] : memref<2x224xf32, #tpu.memory_space<vmem>>, vector<1x64xf32>
    %6 = vector.broadcast %5 : vector<1x64xf32> to vector<16x64xf32>
    %7 = arith.mulf %4, %6 : vector<16x64xf32>
    %c1 = arith.constant 1 : index
    %c0_5 = arith.constant 0 : index
    %8 = vector.load %arg7[%c1, %c0_5] : memref<2x224xf32, #tpu.memory_space<vmem>>, vector<1x64xf32>
    %9 = vector.broadcast %8 : vector<1x64xf32> to vector<16x64xf32>
    %10 = arith.addf %7, %9 : vector<16x64xf32>
    %cst_6 = arith.constant 0.000000e+00 : f32
    %11 = vector.broadcast %cst_6 : f32 to vector<16x64xf32>
    %12 = arith.maximumf %10, %11 : vector<16x64xf32>
    %13 = tpu.iota {dimensions = array<i32: 0>} : vector<16x64xi32>
    %14 = tpu.iota {dimensions = array<i32: 1>} : vector<16x64xi32>
    %cst_7 = arith.constant 0.000000e+00 : f32
    %15 = vector.broadcast %cst_7 : f32 to vector<16x64xf32>
    %cst_8 = arith.constant 0.000000e+00 : f32
    %16 = vector.broadcast %cst_8 : f32 to vector<16x64xf32>
    %c0_i32 = arith.constant 0 : i32
    %17 = vector.broadcast %c0_i32 : i32 to vector<16x64xi32>
    %18 = arith.cmpi sge, %14, %17 : vector<16x64xi32>
    %c32_i32 = arith.constant 32 : i32
    %19 = vector.broadcast %c32_i32 : i32 to vector<16x64xi32>
    %20 = arith.cmpi slt, %14, %19 : vector<16x64xi32>
    %21 = arith.andi %18, %20 : vector<16x64xi1>
    %c1_i32 = arith.constant 1 : i32
    %22 = vector.broadcast %c1_i32 : i32 to vector<16x64xi32>
    %23 = arith.cmpi sge, %13, %22 : vector<16x64xi32>
    %24 = arith.andi %23, %21 : vector<16x64xi1>
    %25 = arith.extui %24 : vector<16x64xi1> to vector<16x64xi32>
    %26 = arith.sitofp %25 : vector<16x64xi32> to vector<16x64xf32>
    %c15_i32 = arith.constant 15 : i32
    %27 = vector.broadcast %c15_i32 : i32 to vector<16x64xi32>
    %28 = arith.cmpi slt, %13, %27 : vector<16x64xi32>
    %29 = arith.andi %28, %21 : vector<16x64xi1>
    %30 = arith.extui %29 : vector<16x64xi1> to vector<16x64xi32>
    %31 = arith.sitofp %30 : vector<16x64xi32> to vector<16x64xf32>
    %c1_i32_9 = arith.constant 1 : i32
    %32 = tpu.dynamic_rotate %12 by %c1_i32_9 dim 0 : vector<16x64xf32>, i32 -> vector<16x64xf32>
    %33 = arith.mulf %32, %26 : vector<16x64xf32>
    %34 = arith.addf %15, %33 : vector<16x64xf32>
    %c15_i32_10 = arith.constant 15 : i32
    %35 = tpu.dynamic_rotate %12 by %c15_i32_10 dim 0 : vector<16x64xf32>, i32 -> vector<16x64xf32>
    %36 = arith.mulf %35, %31 : vector<16x64xf32>
    %37 = arith.addf %16, %36 : vector<16x64xf32>
    %c32_i32_11 = arith.constant 32 : i32
    %38 = vector.broadcast %c32_i32_11 : i32 to vector<16x64xi32>
    %39 = arith.cmpi sge, %14, %38 : vector<16x64xi32>
    %c48_i32 = arith.constant 48 : i32
    %40 = vector.broadcast %c48_i32 : i32 to vector<16x64xi32>
    %41 = arith.cmpi slt, %14, %40 : vector<16x64xi32>
    %42 = arith.andi %39, %41 : vector<16x64xi1>
    %c2_i32 = arith.constant 2 : i32
    %43 = vector.broadcast %c2_i32 : i32 to vector<16x64xi32>
    %44 = arith.cmpi sge, %13, %43 : vector<16x64xi32>
    %45 = arith.andi %44, %42 : vector<16x64xi1>
    %46 = arith.extui %45 : vector<16x64xi1> to vector<16x64xi32>
    %47 = arith.sitofp %46 : vector<16x64xi32> to vector<16x64xf32>
    %c14_i32 = arith.constant 14 : i32
    %48 = vector.broadcast %c14_i32 : i32 to vector<16x64xi32>
    %49 = arith.cmpi slt, %13, %48 : vector<16x64xi32>
    %50 = arith.andi %49, %42 : vector<16x64xi1>
    %51 = arith.extui %50 : vector<16x64xi1> to vector<16x64xi32>
    %52 = arith.sitofp %51 : vector<16x64xi32> to vector<16x64xf32>
    %c2_i32_12 = arith.constant 2 : i32
    %53 = tpu.dynamic_rotate %12 by %c2_i32_12 dim 0 : vector<16x64xf32>, i32 -> vector<16x64xf32>
    %54 = arith.mulf %53, %47 : vector<16x64xf32>
    %55 = arith.addf %34, %54 : vector<16x64xf32>
    %c14_i32_13 = arith.constant 14 : i32
    %56 = tpu.dynamic_rotate %12 by %c14_i32_13 dim 0 : vector<16x64xf32>, i32 -> vector<16x64xf32>
    %57 = arith.mulf %56, %52 : vector<16x64xf32>
    %58 = arith.addf %37, %57 : vector<16x64xf32>
    %c48_i32_14 = arith.constant 48 : i32
    %59 = vector.broadcast %c48_i32_14 : i32 to vector<16x64xi32>
    %60 = arith.cmpi sge, %14, %59 : vector<16x64xi32>
    %c64_i32 = arith.constant 64 : i32
    %61 = vector.broadcast %c64_i32 : i32 to vector<16x64xi32>
    %62 = arith.cmpi slt, %14, %61 : vector<16x64xi32>
    %63 = arith.andi %60, %62 : vector<16x64xi1>
    %c3_i32 = arith.constant 3 : i32
    %64 = vector.broadcast %c3_i32 : i32 to vector<16x64xi32>
    %65 = arith.cmpi sge, %13, %64 : vector<16x64xi32>
    %66 = arith.andi %65, %63 : vector<16x64xi1>
    %67 = arith.extui %66 : vector<16x64xi1> to vector<16x64xi32>
    %68 = arith.sitofp %67 : vector<16x64xi32> to vector<16x64xf32>
    %c13_i32 = arith.constant 13 : i32
    %69 = vector.broadcast %c13_i32 : i32 to vector<16x64xi32>
    %70 = arith.cmpi slt, %13, %69 : vector<16x64xi32>
    %71 = arith.andi %70, %63 : vector<16x64xi1>
    %72 = arith.extui %71 : vector<16x64xi1> to vector<16x64xi32>
    %73 = arith.sitofp %72 : vector<16x64xi32> to vector<16x64xf32>
    %c3_i32_15 = arith.constant 3 : i32
    %74 = tpu.dynamic_rotate %12 by %c3_i32_15 dim 0 : vector<16x64xf32>, i32 -> vector<16x64xf32>
    %75 = arith.mulf %74, %68 : vector<16x64xf32>
    %76 = arith.addf %55, %75 : vector<16x64xf32>
    %c13_i32_16 = arith.constant 13 : i32
    %77 = tpu.dynamic_rotate %12 by %c13_i32_16 dim 0 : vector<16x64xf32>, i32 -> vector<16x64xf32>
    %78 = arith.mulf %77, %73 : vector<16x64xf32>
    %79 = arith.addf %58, %78 : vector<16x64xf32>
    %80 = tpu.concatenate %76, %12, %79 in 1 : vector<16x64xf32>, vector<16x64xf32>, vector<16x64xf32> -> vector<16x192xf32>
    %81 = arith.truncf %80 : vector<16x192xf32> to vector<16x192xbf16>
    %c0_17 = arith.constant 0 : index
    %c0_18 = arith.constant 0 : index
    %82 = vector.load %arg3[%c0_17, %c0_18] : memref<192x64xbf16, #tpu.memory_space<vmem>>, vector<192x64xbf16>
    %cst_19 = arith.constant dense<0.000000e+00> : vector<16x64xf32>
    %83 = tpu.matmul %81, %82, %cst_19 {dimension_numbers = #tpu.dot_dimension_numbers<[1], [0], [0], [1], [0, 0, 1, 1], [], []>} : vector<16x192xbf16>, vector<192x64xbf16>, vector<16x64xf32> -> vector<16x64xf32>
    %c0_20 = arith.constant 0 : index
    %c64 = arith.constant 64 : index
    %84 = vector.load %arg7[%c0_20, %c64] : memref<2x224xf32, #tpu.memory_space<vmem>>, vector<1x64xf32>
    %85 = vector.broadcast %84 : vector<1x64xf32> to vector<16x64xf32>
    %86 = arith.mulf %83, %85 : vector<16x64xf32>
    %c1_21 = arith.constant 1 : index
    %c64_22 = arith.constant 64 : index
    %87 = vector.load %arg7[%c1_21, %c64_22] : memref<2x224xf32, #tpu.memory_space<vmem>>, vector<1x64xf32>
    %88 = vector.broadcast %87 : vector<1x64xf32> to vector<16x64xf32>
    %89 = arith.addf %86, %88 : vector<16x64xf32>
    %cst_23 = arith.constant 0.000000e+00 : f32
    %90 = vector.broadcast %cst_23 : f32 to vector<16x64xf32>
    %91 = arith.maximumf %89, %90 : vector<16x64xf32>
    %92 = arith.truncf %91 : vector<16x64xf32> to vector<16x64xbf16>
    %c0_24 = arith.constant 0 : index
    %c0_25 = arith.constant 0 : index
    %93 = vector.load %arg4[%c0_24, %c0_25] : memref<64x192xbf16, #tpu.memory_space<vmem>>, vector<64x192xbf16>
    %cst_26 = arith.constant dense<0.000000e+00> : vector<16x192xf32>
    %94 = tpu.matmul %92, %93, %cst_26 {dimension_numbers = #tpu.dot_dimension_numbers<[1], [0], [0], [1], [0, 0, 1, 1], [], []>} : vector<16x64xbf16>, vector<64x192xbf16>, vector<16x192xf32> -> vector<16x192xf32>
    %95 = vector.extract_strided_slice %94 {offsets = [0, 0], sizes = [16, 64], strides = [1, 1]} : vector<16x192xf32> to vector<16x64xf32>
    %96 = vector.extract_strided_slice %94 {offsets = [0, 64], sizes = [16, 64], strides = [1, 1]} : vector<16x192xf32> to vector<16x64xf32>
    %97 = arith.addf %95, %96 : vector<16x64xf32>
    %98 = vector.extract_strided_slice %94 {offsets = [0, 128], sizes = [16, 64], strides = [1, 1]} : vector<16x192xf32> to vector<16x64xf32>
    %99 = arith.addf %97, %98 : vector<16x64xf32>
    %cst_27 = arith.constant dense<0.000000e+00> : vector<64xf32>
    %100 = vector.multi_reduction <add>, %99, %cst_27 [0] : vector<16x64xf32> to vector<64xf32>
    %101 = vector.shape_cast %100 : vector<64xf32> to vector<1x64xf32>
    %cst_28 = arith.constant 1.600000e+01 : f32
    %102 = vector.broadcast %cst_28 : f32 to vector<1x64xf32>
    %103 = arith.divf %101, %102 : vector<1x64xf32>
    %c0_29 = arith.constant 0 : index
    %c0_30 = arith.constant 0 : index
    %104 = vector.load %arg5[%c0_29, %c0_30] : memref<64x32xf32, #tpu.memory_space<vmem>>, vector<64x32xf32>
    %cst_31 = arith.constant dense<0.000000e+00> : vector<1x32xf32>
    %105 = tpu.matmul %103, %104, %cst_31 {dimension_numbers = #tpu.dot_dimension_numbers<[1], [0], [0], [1], [0, 0, 1, 1], [], []>} : vector<1x64xf32>, vector<64x32xf32>, vector<1x32xf32> -> vector<1x32xf32>
    %c0_32 = arith.constant 0 : index
    %c192 = arith.constant 192 : index
    %106 = vector.load %arg7[%c0_32, %c192] : memref<2x224xf32, #tpu.memory_space<vmem>>, vector<1x32xf32>
    %107 = arith.mulf %105, %106 : vector<1x32xf32>
    %c1_33 = arith.constant 1 : index
    %c192_34 = arith.constant 192 : index
    %108 = vector.load %arg7[%c1_33, %c192_34] : memref<2x224xf32, #tpu.memory_space<vmem>>, vector<1x32xf32>
    %109 = arith.addf %107, %108 : vector<1x32xf32>
    %cst_35 = arith.constant 0.000000e+00 : f32
    %110 = vector.broadcast %cst_35 : f32 to vector<1x32xf32>
    %111 = arith.maximumf %109, %110 : vector<1x32xf32>
    %c0_36 = arith.constant 0 : index
    %c0_37 = arith.constant 0 : index
    %112 = vector.load %arg6[%c0_36, %c0_37] : memref<32x192xf32, #tpu.memory_space<vmem>>, vector<32x192xf32>
    %cst_38 = arith.constant dense<0.000000e+00> : vector<1x192xf32>
    %113 = tpu.matmul %111, %112, %cst_38 {dimension_numbers = #tpu.dot_dimension_numbers<[1], [0], [0], [1], [0, 0, 1, 1], [], []>} : vector<1x32xf32>, vector<32x192xf32>, vector<1x192xf32> -> vector<1x192xf32>
    %114 = vector.extract_strided_slice %113 {offsets = [0, 0], sizes = [1, 64], strides = [1, 1]} : vector<1x192xf32> to vector<1x64xf32>
    %115 = vector.extract_strided_slice %113 {offsets = [0, 64], sizes = [1, 64], strides = [1, 1]} : vector<1x192xf32> to vector<1x64xf32>
    %116 = vector.extract_strided_slice %113 {offsets = [0, 128], sizes = [1, 64], strides = [1, 1]} : vector<1x192xf32> to vector<1x64xf32>
    %117 = arith.maximumf %114, %115 : vector<1x64xf32>
    %118 = arith.maximumf %117, %116 : vector<1x64xf32>
    %119 = arith.subf %114, %118 : vector<1x64xf32>
    %120 = math.exp %119 : vector<1x64xf32>
    %121 = arith.subf %115, %118 : vector<1x64xf32>
    %122 = math.exp %121 : vector<1x64xf32>
    %123 = arith.subf %116, %118 : vector<1x64xf32>
    %124 = math.exp %123 : vector<1x64xf32>
    %125 = arith.addf %120, %122 : vector<1x64xf32>
    %126 = arith.addf %125, %124 : vector<1x64xf32>
    %127 = tpu.reciprocal %126 {approx = true} : vector<1x64xf32> -> vector<1x64xf32>
    %128 = arith.mulf %120, %127 : vector<1x64xf32>
    %129 = arith.mulf %122, %127 : vector<1x64xf32>
    %130 = arith.mulf %124, %127 : vector<1x64xf32>
    %131 = tpu.concatenate %128, %129, %130 in 1 : vector<1x64xf32>, vector<1x64xf32>, vector<1x64xf32> -> vector<1x192xf32>
    %132 = vector.broadcast %131 : vector<1x192xf32> to vector<16x192xf32>
    %133 = arith.mulf %94, %132 : vector<16x192xf32>
    %134 = vector.extract_strided_slice %133 {offsets = [0, 0], sizes = [16, 64], strides = [1, 1]} : vector<16x192xf32> to vector<16x64xf32>
    %135 = vector.extract_strided_slice %133 {offsets = [0, 64], sizes = [16, 64], strides = [1, 1]} : vector<16x192xf32> to vector<16x64xf32>
    %136 = arith.addf %134, %135 : vector<16x64xf32>
    %137 = vector.extract_strided_slice %133 {offsets = [0, 128], sizes = [16, 64], strides = [1, 1]} : vector<16x192xf32> to vector<16x64xf32>
    %138 = arith.addf %136, %137 : vector<16x64xf32>
    %c0_39 = arith.constant 0 : index
    %c128 = arith.constant 128 : index
    %139 = vector.load %arg7[%c0_39, %c128] : memref<2x224xf32, #tpu.memory_space<vmem>>, vector<1x64xf32>
    %140 = vector.broadcast %139 : vector<1x64xf32> to vector<16x64xf32>
    %141 = arith.mulf %138, %140 : vector<16x64xf32>
    %c1_40 = arith.constant 1 : index
    %c128_41 = arith.constant 128 : index
    %142 = vector.load %arg7[%c1_40, %c128_41] : memref<2x224xf32, #tpu.memory_space<vmem>>, vector<1x64xf32>
    %143 = vector.broadcast %142 : vector<1x64xf32> to vector<16x64xf32>
    %144 = arith.addf %141, %143 : vector<16x64xf32>
    %145 = arith.addf %144, %3 : vector<16x64xf32>
    %cst_42 = arith.constant 0.000000e+00 : f32
    %146 = vector.broadcast %cst_42 : f32 to vector<16x64xf32>
    %147 = arith.maximumf %145, %146 : vector<16x64xf32>
    %c0_43 = arith.constant 0 : index
    %c0_44 = arith.constant 0 : index
    %148 = vector.load %arg8[%c0_43, %c0_44] : memref<16x64xf32, #tpu.memory_space<vmem>>, vector<16x64xf32>
    tpu.vector_store %arg8[%c0_43, %c0_44], %147 {strides = array<i32>} : memref<16x64xf32, #tpu.memory_space<vmem>>, vector<16x64xf32>,
    return
  }
  func.func @transform_0(%arg0: i32) -> (i32, i32) {
    %c0_i32 = arith.constant 0 : i32
    %c0_i32_0 = arith.constant 0 : i32
    return %arg0, %c0_i32 : i32, i32
  }
  func.func @transform_1(%arg0: i32) -> (i32, i32) {
    %c0_i32 = arith.constant 0 : i32
    %c0_i32_0 = arith.constant 0 : i32
    %c0_i32_1 = arith.constant 0 : i32
    return %c0_i32, %c0_i32_0 : i32, i32
  }
  func.func @transform_2(%arg0: i32) -> (i32, i32) {
    %c0_i32 = arith.constant 0 : i32
    %c0_i32_0 = arith.constant 0 : i32
    %c0_i32_1 = arith.constant 0 : i32
    return %c0_i32, %c0_i32_0 : i32, i32
  }
  func.func @transform_3(%arg0: i32) -> (i32, i32) {
    %c0_i32 = arith.constant 0 : i32
    %c0_i32_0 = arith.constant 0 : i32
    %c0_i32_1 = arith.constant 0 : i32
    return %c0_i32, %c0_i32_0 : i32, i32
  }
  func.func @transform_4(%arg0: i32) -> (i32, i32) {
    %c0_i32 = arith.constant 0 : i32
    %c0_i32_0 = arith.constant 0 : i32
    %c0_i32_1 = arith.constant 0 : i32
    return %c0_i32, %c0_i32_0 : i32, i32
  }
  func.func @transform_5(%arg0: i32) -> (i32, i32) {
    %c0_i32 = arith.constant 0 : i32
    %c0_i32_0 = arith.constant 0 : i32
    %c0_i32_1 = arith.constant 0 : i32
    return %c0_i32, %c0_i32_0 : i32, i32
  }
  func.func @transform_6(%arg0: i32) -> (i32, i32) {
    %c0_i32 = arith.constant 0 : i32
    %c0_i32_0 = arith.constant 0 : i32
    %c0_i32_1 = arith.constant 0 : i32
    return %c0_i32, %c0_i32_0 : i32, i32
  }
  func.func @transform_7(%arg0: i32) -> (i32, i32) {
    %c0_i32 = arith.constant 0 : i32
    %c0_i32_0 = arith.constant 0 : i32
    return %arg0, %c0_i32 : i32, i32
  }
}

</mosaic_0001>

<bundles_post_ra>
// kernel: tpu_custom_call.1
= control target key start
LH: loop header
LB: loop body
LE: loop exit
PB: predicated region body
PF: predicated region fallthrough
CT: control target
= control target key end

     0   :  { %12 = vsyncpa [#allocation3], 0  ;;  %s1838_s0 = inlined_call_operand.vmem [shape: bf16[32,32], index: 0, kind: input, shape index: {}]   ;;  %s1839_s1 = inlined_call_operand.vmem [shape: bf16[32,128], index: 1, kind: input, shape index: {}]   ;;  %s1840_s2 = inlined_call_operand.vmem [shape: bf16[192,64], index: 2, kind: input, shape index: {}]   ;;  %s1841_s3 = inlined_call_operand.vmem [shape: bf16[64,192], index: 3, kind: input, shape index: {}]   ;;  %s1842_s4 = inlined_call_operand.vmem [shape: f32[64,32], index: 4, kind: input, shape index: {}]   ;;  %s1843_s5 = inlined_call_operand.vmem [shape: f32[32,192], index: 5, kind: input, shape index: {}]   ;;  %s1844_s6 = inlined_call_operand.vmem [shape: f32[2,224], index: 6, kind: input, shape index: {}]   ;;  %s1845_s7 = inlined_call_operand.hbm [shape: f32[32,64], index: 7, kind: output, shape index: {}]  }
   0x1   :  { %14 = vsyncpa [#allocation3 + $0x1], 0  ;;  %s1424_s24 = smov 0   ;;  %s1426_s25 = smov 0  }
   0x2   :  { %s1428_s26 = smov 0   ;;  %s1430_s27 = smov 0  }
   0x3 LB: > { %s1445_s28 = sadd.s32 4294967295, %s1374_s27   ;;  %s1110_s29 = sadd.s32 4294967294, %s1374_s27   ;;  %s1374_s27 = sphi %s1430_s27, %s1867_s27   ;;  %s1370_s26 = sphi %s1428_s26, %s1866_s26   ;;  %s1366_s25 = sphi %s1426_s25, %s1865_s25   ;;  %s1362_s24 = sphi %s1424_s24, %s1864_s24  }
   0x4   : > { %s1449_s30 = sadd.s32 1, %s1374_s27   ;;  %s179_s8 = sadd.s32 1, %s1370_s26 }
   0x5   : > { %s176_s9 = ssub.s32 %s1374_s27, %s1449_s30  ;;  %p189_p0 = scmp.ne.s32.totalorder %s1370_s26, %s1366_s25 }
   0x6   : > { %p177_p1 = scmp.eq.s32.totalorder %s176_s9, 0  ;;  %p190_p2 = scmp.eq.s32.totalorder %s1445_s28, 1 }
   0x7   : > { %p195_p3 = scmp.ne.s32.totalorder %s1366_s25, %s1362_s24  ;;  %p196_p4 = scmp.eq.s32.totalorder %s1110_s29, 1 }
   0x8   : > { %s1460_s10 = scalar_select %p177_p1, %s1370_s26, %s179_s8  }
   0x9   : > { %p1462_p5 = por %p190_p2, %p189_p0  ;;  %p1466_p6 = por %p196_p4, %p195_p3 }
   0xa   : > { %p1113_p7 = scmp.ge.s32.totalorder %s1374_s27, 1  ;;  %p241_p8 = scmp.lt.s32.totalorder %s1374_s27, 3 }
   0xc   : > { %p242_p9 = pnand %p1113_p7, %p241_p8 }
   0xd   : > { %v1277_v0 = vld [vmem:[%s1839_s1] sm:$0xff] (!%p242_p9)   ;;  %v1376_v1 = vmov (!%p242_p9), 0.0   ;;  %v1278_v2 = vld [vmem:[%s1839_s1 + $0x8] sm:$0xff] (!%p242_p9)   ;;  %vm1377_vm0 = vmmov (!%p242_p9), 0   ;;  %s1115_s17 = sshll.u32 (!%p242_p9), %s1445_s28, 1  ;;  %vm304_vm1 = vcmask (!%p242_p9), 261120   ;;  %v365_v17 = vlaneseq (!%p242_p9) }
   0xe   : > { %245 = sbr.rel (%p242_p9) target bundleno = 2012 (0x7dc), region = 48  ;;  %1179 = vmatprep.subr.bf16.mxu0 (!%p242_p9), %v1376_v1  ;;  %1183 = vmatprep.mubr.msk.bf16.mxu0 (!%p242_p9), %vm1377_vm0, %v1376_v1  ;;  %p274_p10 = scmp.lt.s32.totalorder (!%p242_p9), %s1115_s17, 3  ;;  %v1490_v4 = vld [vmem:[%s1844_s6 + $0x1] ss:$0 sm:$0xff] (!%p242_p9)  ;;  %v1379_v6 = vmov (!%p242_p9), 0   ;;  %v1281_v7 = vld [vmem:[%s1840_s2 + $0x8] sm:$0xff] (!%p242_p9)  }
   0xf   : > { %1180 = vmatpush3.bf16.msra.mxu0 (!%p242_p9), %v1277_v0  ;;  %s1378_s29 = smov (!%p242_p9), 64   ;;  %v1280_v5 = vld [vmem:[%s1840_s2] sm:$0xff] (!%p242_p9)   ;;  %593 = vmatprep.subr.bf16.mxu1 (!%p242_p9), %v1379_v6  ;;  %v1282_v8 = vld [vmem:[%s1840_s2 + $0x10] sm:$0xff] (!%p242_p9)   ;;  %v1283_v9 = vld [vmem:[%s1840_s2 + $0x18] sm:$0xff] (!%p242_p9)   ;;  %v1527_v18 = vshrl.u32 (!%p242_p9), %v365_v17, 7  ;;  %v369_v19 = vand.u32 (!%p242_p9), 127, %v365_v17 }
  0x10   : > { %1181 = vmatprep.subr.bf16.mxu0 (!%p242_p9), %v1376_v1  ;;  %641 = vrot.lane.b32.xlu1 (!%p242_p9), %v1490_v4, %s1378_s29  ;;  %v1284_v10 = vld [vmem:[%s1840_s2 + $0x20] sm:$0xff] (!%p242_p9)   ;;  %v1285_v11 = vld [vmem:[%s1840_s2 + $0x28] sm:$0xff] (!%p242_p9)   ;;  %v1286_v12 = vld [vmem:[%s1840_s2 + $0x30] sm:$0xff] (!%p242_p9)   ;;  %s270_s8 = sand.u32 (!%p242_p9), 1, %s1366_s25   ;;  %s1381_s19 = smov (!%p242_p9), [#allocation2]  }
  0x11   : > { %594 = vmatpush1.bf16.msra.mxu1 (!%p242_p9), %v1280_v5  ;;  %v1287_v13 = vld [vmem:[%s1840_s2 + $0x38] sm:$0xff] (!%p242_p9)   ;;  %v1288_v14 = vld [vmem:[%s1840_s2 + $0x40] sm:$0xff] (!%p242_p9)   ;;  %v1289_v15 = vld [vmem:[%s1840_s2 + $0x48] sm:$0xff] (!%p242_p9)   ;;  %v367_v20 = vadd.s32 (!%p242_p9), 8, %v1527_v18  ;;  %vm407_vm2 = vcmp.ge.s32.totalorder (!%p242_p9), %v369_v19, 32  ;;  %vm408_vm3 = vcmp.lt.s32.totalorder (!%p242_p9), %v369_v19, 48 }
  0x12   : > { %595 = vmatprep.subr.bf16.mxu1 (!%p242_p9), %v1379_v6  ;;  %v1290_v16 = vld [vmem:[%s1840_s2 + $0x50] sm:$0xff] (!%p242_p9)   ;;  %vm371_vm4 = vcmp.lt.s32.totalorder (!%p242_p9), %v369_v19, 32  ;;  %vm373_vm5 = vcmp.ge.s32.totalorder (!%p242_p9), %v1527_v18, 1  ;;  %vm1531_vm7 = vmand (!%p242_p9), %vm407_vm2, %vm408_vm3  ;;  %vm444_vm8 = vcmp.ge.s32.totalorder (!%p242_p9), %v369_v19, 48  ;;  %vm445_vm9 = vcmp.lt.s32.totalorder (!%p242_p9), %v369_v19, 64  ;;  %v1291_v24 = vld [vmem:[%s1840_s2 + $0x58] sm:$0xff] (!%p242_p9)  }
  0x13   : > { %1182 = vmatpush3.bf16.msra.mxu0 (!%p242_p9), %v1278_v2  ;;  %vm382_vm6 = vcmp.lt.s32.totalorder (!%p242_p9), %v367_v20, 15  ;;  %v1538_v22 = vld [vmem:[%s1844_s6] ss:$0 sm:$0xff] (!%p242_p9)  ;;  %vm1541_vm10 = vmand (!%p242_p9), %vm373_vm5, %vm371_vm4  ;;  %vm410_vm11 = vcmp.ge.s32.totalorder (!%p242_p9), %v1527_v18, 2  ;;  %vm419_vm13 = vcmp.lt.s32.totalorder (!%p242_p9), %v367_v20, 14  ;;  %vm447_vm15 = vcmp.ge.s32.totalorder (!%p242_p9), %v1527_v18, 3 }
  0x14   : > { %vm1550_vm12 = vmand (!%p242_p9), %vm382_vm6, %vm371_vm4  ;;  %vm456_vm3 = vcmp.lt.s32.totalorder (!%p242_p9), %v367_v20, 13  ;;  %vm391_vm5 = vcmp.lt.s32.totalorder (!%p242_p9), %v1527_v18, 1  ;;  %vm400_vm6 = vcmp.lt.s32.totalorder (!%p242_p9), %v1527_v18, 7  ;;  %v1292_v37 = vld [vmem:[%s1841_s3] ss:$8 sps:$4 sm:$0xff] (!%p242_p9)   ;;  %v1123_v39 = vsel (!%p242_p9), %vm1541_vm10, 1.0, %v1376_v1 }
  0x15   : > { %s1869_s17 = smov (!%p274_p10, %s1115_s17), 3  ;;  %596 = vmatpush1.bf16.msra.mxu1 %v1281_v7  ;;  %vm1556_vm14 = vmand %vm444_vm8, %vm445_vm9  ;;  %vm428_vm9 = vcmp.lt.s32.totalorder %v1527_v18, 2  ;;  %v1294_v38 = vld [vmem:[%s1841_s3 + $0x4] ss:$8 sps:$4 sm:$0xff]   ;;  %v1124_v40 = vsel %vm371_vm4, 1.0, %v1376_v1  ;;  %v1128_v41 = vsel %vm1531_vm7, 1.0, %v1376_v1 }
  0x16   : > { %s1116_s18 = sshll.u32 %s1869_s17, 2  ;;  %597 = vmatprep.subr.bf16.mxu1 %v1379_v6  ;;  %vm1565_vm2 = vmand %vm410_vm11, %vm1531_vm7  ;;  %v1297_v43 = vld [vmem:[%s1841_s3 + $0x14] ss:$8 sps:$4 sm:$0xff]   ;;  %v1126_v46 = vsel %vm1550_vm12, 1.0, %v1376_v1  ;;  %700 = vmatprep.subr.bf16.mxu0 %v1294_v38  ;;  %v1132_v49 = vsel %vm1556_vm14, 1.0, %v1376_v1  ;;  %vm465_vm4 = vcmp.lt.s32.totalorder %v1527_v18, 3 }
  0x17   : > { %s277_s21 = scalar_lea.vmem %s1838_s0, %s1116_s18  ;;  %vm1575_vm8 = vmand %vm419_vm13, %vm1531_vm7  ;;  %vm437_vm13 = vcmp.lt.s32.totalorder %v1527_v18, 6  ;;  %v1127_v47 = vsel %vm1565_vm2, 1.0, %v1376_v1  ;;  %vm474_vm7 = vcmp.lt.s32.totalorder %v1527_v18, 5  ;;  %v1295_v50 = vld [vmem:[%s1841_s3 + $0x10] ss:$8 sps:$4 sm:$0xff]   ;;  %vm489_vm10 = vcmask 523264  }
  0x18   : > { %v1279_v3 = vld [vmem:[%s277_s21] sm:$0xff]   ;;  %vm1585_vm11 = vmand %vm447_vm15, %vm1556_vm14  ;;  %v1130_v48 = vsel %vm1575_vm8, 1.0, %v1376_v1  ;;  %s1114_s9 = sshll.u32 %s270_s8, 4  ;;  %s1316_s20 = sshll.u32 %s1381_s19, 4  ;;  %s1317_s20 = int_to_ptr.vmem [resolvable:$false] %s1316_s20 }
  0x19   : > { %1184 = vmatmul.mubr.msk.bf16.vlgmr.msra.gmra.mrb[0].mxu0 %vm304_vm1, %v1279_v3  ;;  %598 = vmatpush1.bf16.msra.mxu1 %v1282_v8  ;;  %vm1607_vm15 = vmand %vm456_vm3, %vm1556_vm14  ;;  %v1131_v53 = vsel %vm1585_vm11, 1.0, %v1376_v1  ;;  %s272_s13 = scalar_lea.vmem [#allocation2], %s1114_s9  ;;  %s1318_s21 = scalar_lea.vmem %s1317_s20, 512 }
  0x1a   : > { %732 = vmatprep.mubr.bf16.mxu0 %v1379_v6  ;;  %599 = vmatprep.subr.bf16.mxu1 %v1379_v6  ;;  %v1134_v54 = vsel %vm1607_vm15, 1.0, %v1376_v1  ;;  %s1048_s14 = sshll.u32 %s272_s13, 4  ;;  %s1788_s14 = int_to_ptr.vmem [resolvable:$true] %s1048_s14 }
  0x1b   : > { %701 = vmatpush1.bf16.msra.mxu0 %v1292_v37  ;;  %s1312_s18 = scalar_lea.vmem %s1788_s14, 256  ;;  %p1319_p0 = scmp.lt.s32.totalorder %s1788_s14, %s1317_s20 }
  0x1c   : > { %702 = vmatprep.subr.bf16.mxu0 %v1297_v43  ;;  %p1313_p11 = scmp.ne.s32.totalorder %s1788_s14, %s1312_s18  ;;  %p1320_p1 = scmp.lt.s32.totalorder %s1318_s21, %s1312_s18 }
  0x1d   : > { %600 = vmatpush1.bf16.msra.mxu1 %v1283_v9 }
  0x1e   : > { %601 = vmatprep.subr.bf16.mxu1 %v1379_v6  ;;  %p1314_p12 = pnand %p1313_p11, %p1462_p5  ;;  %p1321_p2 = por %p1320_p1, %p1319_p0 }
  0x1f   : > { %703 = vmatpush1.bf16.msra.mxu0 %v1295_v50 }
  0x20   : > { %p1315_p13 = pneg %p1314_p12 }
  0x21   : > { %602 = vmatpush1.bf16.msra.mxu1 %v1284_v10 }
  0x22   : > { %603 = vmatprep.subr.bf16.mxu1 %v1379_v6  ;;  %p1322_p3 = pnand %p1321_p2, %p1315_p13 }
  0x25   : > { %604 = vmatpush1.bf16.msra.mxu1 %v1285_v11 }
  0x26   : > { %605 = vmatprep.subr.bf16.mxu1 %v1379_v6 }
  0x29   : > { %606 = vmatpush1.bf16.msra.mxu1 %v1286_v12 }
  0x2a   : > { %607 = vmatprep.subr.bf16.mxu1 %v1379_v6 }
  0x2d   : > { %608 = vmatpush1.bf16.msra.mxu1 %v1287_v13 }
  0x2e   : > { %609 = vmatprep.subr.bf16.mxu1 %v1379_v6 }
  0x31   : > { %610 = vmatpush1.bf16.msra.mxu1 %v1288_v14 }
  0x32   : > { %611 = vmatprep.subr.bf16.mxu1 %v1379_v6 }
  0x35   : > { %612 = vmatpush1.bf16.msra.mxu1 %v1289_v15 }
  0x36   : > { %613 = vmatprep.subr.bf16.mxu1 %v1379_v6 }
  0x39   : > { %614 = vmatpush1.bf16.msra.mxu1 %v1290_v16 }
  0x3a   : > { %615 = vmatprep.subr.bf16.mxu1 %v1379_v6 }
  0x3d   : > { %616 = vmatpush1.bf16.msra.mxu1 %v1291_v24 }
  0xec   : > { %v1554_v26 = vpop.f32.mrb[0].mxu0 }
  0xed   : > { %v354_v28 = vmul.f32 %v1538_v22, %v1554_v26  ;;  %v1185_v29 = vpop.f32.mrb[1].mxu0 }
  0xee   : > { %v1569_v31 = vpop.f32.mrb[2].mxu0 }
  0xef   : > { %v361_v33 = vadd.f32 %v1490_v4, %v354_v28  ;;  %v355_v34 = vmul.f32 %v1538_v22, %v1569_v31  ;;  %v1186_v35 = vpop.f32.mrb[3].mxu0 }
  0xf1   : > { %v363_v44 = vmax.f32 %v361_v33, 0.0  ;;  %v362_v45 = vadd.f32 %v1490_v4, %v355_v34 }
  0xf3   : > { %v364_v51 = vmax.f32 %v362_v45, 0.0  ;;  %v389_v52 = vrot.slane %v363_v44, 7  ;;  %v398_v55 = vrot.slane %v363_v44, 1  ;;  %v426_v56 = vrot.slane %v363_v44, 6 }
  0xf4   : > { %v435_v57 = vrot.slane %v363_v44, 2  ;;  %v463_v58 = vrot.slane %v363_v44, 5  ;;  %v472_v2 = vrot.slane %v363_v44, 3 }
  0xf5   : > { %v1272_v59 = vpack.i.bf16 %v364_v51, %v363_v44  ;;  %v390_v60 = vrot.slane %v364_v51, 7  ;;  %v399_v61 = vrot.slane %v364_v51, 1  ;;  %v427_v62 = vrot.slane %v364_v51, 6 }
  0xf6   : > { %v436_v63 = vrot.slane %v364_v51, 2  ;;  %v464_v0 = vrot.slane %v364_v51, 5  ;;  %v473_v3 = vrot.slane %v364_v51, 3 }
  0xf7   : > { %1273 = vrot.lane.b32.xlu0 %v1272_v59, %s1378_s29  ;;  %v392_v4 = vsel %vm391_vm5, %v389_v52, %v390_v60  ;;  %v401_v5 = vsel %vm400_vm6, %v398_v55, %v399_v61  ;;  %v402_v6 = vsel %vm400_vm6, %v399_v61, %v398_v55  ;;  %v429_v7 = vsel %vm428_vm9, %v426_v56, %v427_v62 }
  0xf8   : > { %v395_v8 = vmul.f32 %v1124_v40, %v392_v4  ;;  %v403_v9 = vmul.f32 %v1124_v40, %v401_v5  ;;  %v404_v10 = vmul.f32 %v1126_v46, %v402_v6  ;;  %v432_v11 = vmul.f32 %v1128_v41, %v429_v7  ;;  %v1300_v46 = vld [vmem:[%s1841_s3 + $0x24] ss:$8 sps:$4 sm:$0xff]  }
  0xf9   : > { %v438_v12 = vsel %vm437_vm13, %v435_v57, %v436_v63  ;;  %v439_v13 = vsel %vm437_vm13, %v436_v63, %v435_v57  ;;  %v466_v14 = vsel %vm465_vm4, %v463_v58, %v464_v0  ;;  %v475_v15 = vsel %vm474_vm7, %v472_v2, %v473_v3  ;;  %704 = vmatprep.subr.bf16.mxu0 %v1300_v46  ;;  %v766_v63 = vld [vmem:[%s1842_s4] sm:$0xff] }
  0xfa   : > { %v440_v16 = vmul.f32 %v1128_v41, %v438_v12  ;;  %v441_v17 = vmul.f32 %v1130_v48, %v439_v13  ;;  %v469_v19 = vmul.f32 %v1132_v49, %v466_v14  ;;  %v476_v20 = vsel %vm474_vm7, %v473_v3, %v472_v2  ;;  %v1303_v48 = vld [vmem:[%s1841_s3 + $0x34] ss:$8 sps:$4 sm:$0xff]   ;;  %v771_v12 = vld [vmem:[%s1842_s4 + $0x28] sm:$0xff] }
  0xfb   : > { %v477_v21 = vmul.f32 %v1132_v49, %v475_v15  ;;  %v478_v23 = vmul.f32 %v1134_v54, %v476_v20  ;;  %v393_v24 = vsel %vm391_vm5, %v390_v60, %v389_v52  ;;  %v430_v25 = vsel %vm428_vm9, %v427_v62, %v426_v56  ;;  %635 = vrot.lane.b32.xlu0 %v1538_v22, %s1378_s29  ;;  %v1301_v49 = vld [vmem:[%s1841_s3 + $0x30] ss:$8 sps:$4 sm:$0xff]   ;;  %v642_v52 = vpop.permute.xlu1 %641  ;;  %v869_v20 = vld [vmem:[%s1843_s5 + $0x8] sm:$0xff] }
  0xfc   : > { %v442_v27 = vadd.f32 %v440_v16, %v403_v9  ;;  %v443_v28 = vadd.f32 %v441_v17, %v404_v10  ;;  %v394_v29 = vmul.f32 %v1123_v39, %v393_v24  ;;  %v431_v30 = vmul.f32 %v1127_v47, %v430_v25  ;;  %v1298_v47 = vld [vmem:[%s1841_s3 + $0x20] ss:$8 sps:$4 sm:$0xff]   ;;  %v769_v9 = vld [vmem:[%s1842_s4 + $0x18] sm:$0xff]  ;;  %v772_v13 = vld [vmem:[%s1842_s4 + $0x30] sm:$0xff] }
  0xfd   : > { %v434_v32 = vadd.f32 %v432_v11, %v395_v8  ;;  %v467_v33 = vsel %vm465_vm4, %v464_v0, %v463_v58  ;;  %705 = vmatpush1.bf16.msra.mxu0 %v1298_v47  ;;  %v767_v0 = vld [vmem:[%s1842_s4 + $0x8] sm:$0xff]  ;;  %v1380_v5 = vmov 0.0|0.0   ;;  %v768_v8 = vld [vmem:[%s1842_s4 + $0x10] sm:$0xff]  ;;  %v770_v11 = vld [vmem:[%s1842_s4 + $0x20] sm:$0xff] }
  0xfe   : > { %v479_v34 = vadd.f32 %v477_v21, %v442_v27  ;;  %v480_v35 = vadd.f32 %v478_v23, %v443_v28  ;;  %v433_v36 = vadd.f32 %v431_v30, %v394_v29  ;;  %v468_v37 = vmul.f32 %v1131_v53, %v467_v33  ;;  %706 = vmatprep.subr.bf16.mxu0 %v1303_v48  ;;  %v773_v15 = vld [vmem:[%s1842_s4 + $0x38] sm:$0xff]  ;;  %v1722_v17 = vld [vmem:[%s1844_s6 + $0x2] ss:$0 sm:$0xff]  ;;  %v874_v47 = vld [vmem:[%s1843_s5 + $0x30] sm:$0xff] }
  0xff   : > { %v471_v38 = vadd.f32 %v469_v19, %v434_v32  ;;  %v1207_v3 = vpack.c.bf16 %v767_v0, %v766_v63  ;;  %v1210_v10 = vpack.c.bf16 %v769_v9, %v768_v8  ;;  %v1213_v14 = vpack.c.bf16 %v771_v12, %v770_v11  ;;  %v1727_v19 = vld [vmem:[%s1844_s6 + $0x3] ss:$0 sm:$0xff]  ;;  %v871_v21 = vld [vmem:[%s1843_s5 + $0x18] sm:$0xff] }
 0x100   : > { %v493_v40 = vpack.c.bf16 %v480_v35, %v479_v34  ;;  %v470_v41 = vadd.f32 %v468_v37, %v433_v36  ;;  %v1216_v16 = vpack.c.bf16 %v773_v15, %v772_v13  ;;  %v1218_v23 = vpack.c.bf16 %v871_v21, %v869_v20 }
 0x101   : > { %707 = vmatpush1.bf16.msra.mxu0 %v1301_v49  ;;  %v851_v15 = vsub.s32 0, %v1527_v18 }
 0x102   : > { %1147 = vmatprep.mubr.msk.bf16.mxu1 %vm489_vm10, %v493_v40  ;;  %1206 = vmatprep.subr.bf16.mxu0 %v1380_v5 }
 0x169   : > { %v1274_v42 = vpop.permute.xlu0 %1273 }
 0x16a   : > { %v1276_v22 = vunpack.i.h.bf16 %v1274_v42  ;;  %v1275_v43 = vunpack.i.l.bf16 %v1274_v42 }
 0x16c   : > { %v490_v39 = vsel %vm489_vm10, %v470_v41, %v1275_v43  ;;  %v491_v44 = vsel %vm489_vm10, %v471_v38, %v1276_v22  ;;  %v868_v22 = vld [vmem:[%s1843_s5] sm:$0xff]  ;;  %v870_v43 = vld [vmem:[%s1843_s5 + $0x10] sm:$0xff] }
 0x16d   : > { %v492_v45 = vpack.c.bf16 %v491_v44, %v490_v39  ;;  %v636_v50 = vpop.permute.xlu0 %635  ;;  %v1220_v39 = vpack.c.bf16 %v870_v43, %v868_v22  ;;  %v873_v44 = vld [vmem:[%s1843_s5 + $0x28] sm:$0xff] }
 0x16f   : > { %626 = vmatmul.mubr.bf16.vlgmr.msra.gmra.mrb[0].mxu1 %v492_v45  ;;  %v875_v45 = vld [vmem:[%s1843_s5 + $0x38] sm:$0xff] }
 0x170   : > { %v1222_v46 = vpack.c.bf16 %v875_v45, %v873_v44 }
 0x242   : > { %v627_v51 = vpop.f32.mrb[0].mxu1 }
 0x243   : > { %v638_v53 = vmul.f32 %v636_v50, %v627_v51  ;;  %v629_v54 = vpop.f32.mrb[1].mxu1 }
 0x244   : > { %v630_v55 = vpop.f32.mrb[2].mxu1 }
 0x245   : > { %v644_v56 = vadd.f32 %v642_v52, %v638_v53  ;;  %v639_v57 = vmul.f32 %v636_v50, %v630_v55  ;;  %v632_v58 = vpop.f32.mrb[3].mxu1 }
 0x247   : > { %v645_v59 = vadd.f32 %v642_v52, %v639_v57  ;;  %v646_v60 = vmax.f32 %v644_v56, 0.0 }
 0x249   : > { %v647_v61 = vmax.f32 %v645_v59, 0.0 }
 0x24b   : > { %v648_v62 = vpack.c.bf16 %v647_v61, %v646_v60 }
 0x24d   : > { %1156 = vmatmul.mubr.msk.bf16.vlgmr.msra.gmra.mrb[4].mxu0 %vm489_vm10, %v648_v62 }
 0x24e   : > { %1203 = vmatprep.mubr.msk.f32.mxu0 %vm1377_vm0, %v1376_v1  ;;  %1208 = vmatpush3.bf16.msra.mxu0 %v1207_v3 }
 0x24f   : > { %1209 = vmatprep.subr.bf16.mxu0 %v1380_v5 }
 0x252   : > { %1211 = vmatpush3.bf16.msra.mxu0 %v1210_v10 }
 0x253   : > { %1212 = vmatprep.subr.bf16.mxu0 %v1380_v5 }
 0x256   : > { %1214 = vmatpush3.bf16.msra.mxu0 %v1213_v14 }
 0x257   : > { %1215 = vmatprep.subr.bf16.mxu0 %v1380_v5 }
 0x25a   : > { %1217 = vmatpush3.bf16.msra.mxu0 %v1216_v16 }
 0x25b   : > { %1219 = vmatprep.subr.bf16.mxu0 %v1218_v23 }
 0x320   : > { %v1689_v2 = vpop.f32.mrb[4].mxu0 }
 0x321   : > { %745 = vrot.lane.b32.xlu1 %v1689_v2, %s1378_s29  ;;  %v1693_v4 = vpop.f32.mrb[5].mxu0 }
 0x322   : > { %v1695_v6 = vpop.f32.mrb[6].mxu0 }
 0x323   : > { %747 = vrot.lane.b32.xlu0 %v1695_v6, %s1378_s29  ;;  %v1699_v7 = vpop.f32.mrb[7].mxu0 }
 0x325   : > { %853 = vrot.lane.b32.xlu1 %v1722_v17, %s1378_s29 }
 0x327   : > { %863 = vrot.lane.b32.xlu0 %v1727_v19, %s1378_s29 }
 0x393   : > { %v746_v24 = vpop.permute.xlu1 %745 }
 0x394   : > { %v751_v25 = vadd.f32 %v746_v24, %v1689_v2 }
 0x395   : > { %v748_v27 = vpop.permute.xlu0 %747 }
 0x396   : > { %v753_v28 = vadd.f32 %v751_v25, %v1693_v4  ;;  %v752_v29 = vadd.f32 %v748_v27, %v1695_v6 }
 0x397   : > { %v854_v49 = vpop.permute.xlu1 %853 }
 0x398   : > { %v754_v30 = vadd.f32 %v752_v29, %v1699_v7  ;;  %v755_v32 = vsel %vm489_vm10, %v753_v28, 0.0 }
 0x399   : > { %v864_v51 = vpop.permute.xlu0 %863 }
 0x39a   : > { %v756_v33 = vsel %vm489_vm10, %v754_v30, 0.0 }
 0x39b   : > { %v757_v34 = vadd.f32 %v756_v33, %v755_v32 }
 0x39d   : > { %v758_v35 = vrot.slane %v757_v34, 4 }
 0x39f   : > { %v759_v36 = vadd.f32 %v758_v35, %v757_v34 }
 0x3a1   : > { %v760_v37 = vrot.slane %v759_v36, 2 }
 0x3a3   : > { %v761_v38 = vadd.f32 %v760_v37, %v759_v36 }
 0x3a5   : > { %v762_v40 = vrot.slane %v761_v38, 1 }
 0x3a7   : > { %v763_v41 = vadd.f32 %v762_v40, %v761_v38 }
 0x3a9   : > { %v765_v42 = vmul.f32 0.0625, %v763_v41 }
 0x3ab   : > { %1204 = vmatmul.mubr.msk.f32.vlgmr.msra.gmra.mrb[8].mxu0 %vm489_vm10, %v765_v42 }
 0x3ac   : > { %943 = vmatprep.mubr.f32.mxu0 %v1376_v1  ;;  %1221 = vmatpush1.bf16.msra.mxu0 %v1220_v39  ;;  %v872_v1 = vld [vmem:[%s1843_s5 + $0x20] sm:$0xff] }
 0x3ad   : > { %v1224_v48 = vpack.c.bf16 %v874_v47, %v872_v1  ;;  %1223 = vmatprep.subr.bf16.mxu0 %v1222_v46 }
 0x3b0   : > { %1225 = vmatpush1.bf16.msra.mxu0 %v1224_v48 }
 0x47e   : > { %v843_v50 = vpop.f32.mrb[8].mxu0 }
 0x47f   : > { %v856_v52 = vmul.f32 %v854_v49, %v843_v50  ;;  %v1205_v53 = vpop.f32.mrb[9].mxu0 }
 0x481   : > { %v866_v54 = vadd.f32 %v864_v51, %v856_v52 }
 0x483   : > { %v867_v55 = vmax.f32 %v866_v54, 0.0 }
 0x485   : > { %1158 = vmatmul.mubr.msk.f32.vlgmr.msra.gmra.mrb[10].mxu0 %vm304_vm1, %v867_v55 }
 0x558   : > { %v945_v56 = vpop.f32.mrb[10].mxu0 }
 0x559   : > { %951 = vrot.lane.b32.xlu1 %v945_v56, %s1378_s29  ;;  %v947_v57 = vpop.f32.mrb[11].mxu0 }
 0x5cb   : > { %v952_v58 = vpop.permute.xlu1 %951 }
 0x5cc   : > { %v954_v59 = vmax.f32 %v945_v56, %v952_v58 }
 0x5ce   : > { %v955_v60 = vmax.f32 %v954_v59, %v947_v57 }
 0x5d0   : > { %v956_v61 = vsub.f32 %v945_v56, %v955_v60  ;;  %v966_v62 = vsub.f32 %v947_v57, %v955_v60  ;;  %960 = vrot.lane.b32.xlu0 %v955_v60, %s1378_s29 }
 0x5d2   : > { %v957_v8 = vmul.f32 1.442695, %v956_v61  ;;  %v967_v9 = vmul.f32 1.442695, %v966_v62 }
 0x642   : > { %v961_v63 = vpop.permute.xlu0 %960 }
 0x643   : > { %v963_v0 = vsub.f32 %v945_v56, %v961_v63 }
 0x645   : > { %v964_v3 = vmul.f32 1.442695, %v963_v0 }
 0x647   : > { %1304 = vpow2.f32 %v964_v3 }
 0x648   : > { %1306 = vpow2.f32 %v957_v8 }
 0x649   : > { %1308 = vpow2.f32 %v967_v9 }
 0x651   : > { %v1305_v5 = vpop.eup %1304 }
 0x652   : > { %970 = vrot.lane.b32.xlu1 %v1305_v5, %s1378_s29  ;;  %v1307_v10 = vpop.eup %1306 }
 0x653   : > { %v1309_v13 = vpop.eup %1308 }
 0x6c4   : > { %v971_v11 = vpop.permute.xlu1 %970 }
 0x6c5   : > { %v973_v12 = vadd.f32 %v1307_v10, %v971_v11 }
 0x6c7   : > { %v974_v14 = vadd.f32 %v1309_v13, %v973_v12 }
 0x6c9   : > { %1310 = vrcp.f32 %v974_v14 }
 0x6d3   : > { %v1311_v16 = vpop.eup %1310 }
 0x6d4   : > { %978 = vrot.lane.b32.xlu0 %v1311_v16, %s1378_s29  ;;  %v976_v20 = vmul.f32 %v1311_v16, %v1307_v10  ;;  %v982_v21 = vmul.f32 %v1311_v16, %v1309_v13 }
 0x6d6   : > { %v991_v23 = vrot.slane %v982_v21, %v851_v15 }
 0x6d8   : > { %v995_v24 = vmul.f32 %v991_v23, %v1699_v7  ;;  %v993_v25 = vmul.f32 %v991_v23, %v1693_v4 }
 0x746   : > { %v979_v27 = vpop.permute.xlu0 %978 }
 0x747   : > { %v981_v28 = vmul.f32 %v1305_v5, %v979_v27 }
 0x749   : > { %v983_v29 = vsel %vm489_vm10, %v976_v20, %v981_v28 }
 0x74a   : > { %v987_v30 = vrot.slane %v983_v29, %v851_v15 }
 0x74c   : > { %v994_v32 = vmul.f32 %v987_v30, %v1695_v6  ;;  %v992_v18 = vmul.f32 %v987_v30, %v1689_v2 }
 0x74e   : > { %1000 = vrot.lane.b32.xlu0 %v994_v32, %s1378_s29  ;;  %998 = vrot.lane.b32.xlu1 %v992_v18, %s1378_s29 }
 0x752   : > { %1024 = vrot.lane.b32.xlu0 %v1569_v31, %s1378_s29  ;;  %1022 = vrot.lane.b32.xlu1 %v1554_v26, %s1378_s29  ;;  %s1164_s29 = sshll.u32 %s1445_s28, 8  ;;  %s1797_s28 = scalar_lea.sflag [#allocation3], %s270_s8 }
 0x753   : > { %s1793_s17 = scalar_lea.hbm %s1845_s7, %s1164_s29 }
 0x7c0   : > { %v1001_v4 = vpop.permute.xlu0 %1000  ;;  %v999_v7 = vpop.permute.xlu1 %998 }
 0x7c1   : > { %v1005_v33 = vadd.f32 %v1001_v4, %v994_v32  ;;  %v1004_v34 = vadd.f32 %v999_v7, %v992_v18 }
 0x7c3   : > { %v1007_v6 = vadd.f32 %v1005_v33, %v995_v24  ;;  %v1006_v35 = vadd.f32 %v1004_v34, %v993_v25 }
 0x7c4   : > { %v1025_v26 = vpop.permute.xlu0 %1024  ;;  %v1023_v38 = vpop.permute.xlu1 %1022 }
 0x7c5   : > { %v1013_v2 = vmul.f32 %v1722_v17, %v1007_v6  ;;  %v1012_v36 = vmul.f32 %v1722_v17, %v1006_v35 }
 0x7c7   : > { %v1019_v37 = vadd.f32 %v1727_v19, %v1013_v2  ;;  %v1018_v31 = vadd.f32 %v1727_v19, %v1012_v36 }
 0x7c9   : > { %v1029_v40 = vadd.f32 %v1025_v26, %v1019_v37  ;;  %v1028_v41 = vadd.f32 %v1023_v38, %v1018_v31 }
 0x7cb   : > { %v1031_v17 = vmax.f32 %v1029_v40, 0.0  ;;  %v1030_v42 = vmax.f32 %v1028_v41, 0.0 }
 0x7cd   : > { %1033 = vst.msk [vmem:[%s272_s13 + $0x8] sm:$0xff] %vm489_vm10, %v1031_v17  ;;  %1032 = vst.msk [vmem:[%s272_s13] sm:$0xff] %vm489_vm10, %v1030_v42 }
 0x7ce   : > { %1325 = shalt.err (!%p1322_p3)
}
 0x7cf   : > { %s1326_s22 = scalar_lea.hbm %s1793_s17, 256  ;;  %s1330_s9 = scalar_lea.hbm %s1845_s7, 512 }
 0x7d0   : > { %p1327_p4 = scmp.ne.s32.totalorder %s1793_s17, %s1326_s22  ;;  %p1331_p9 = scmp.lt.u32.totalorder %s1793_s17, %s1845_s7 }
 0x7d1   : > { %p1332_p10 = scmp.lt.u32.totalorder %s1330_s9, %s1326_s22  ;;  %p1334_p12 = scmp.lt.u32.totalorder %s1326_s22, %s1793_s17 }
 0x7d2   : > { %p1328_p7 = pnand %p1327_p4, %p1462_p5 }
 0x7d3   : > { %p1333_p11 = por %p1332_p10, %p1331_p9 }
 0x7d4   : > { %p1329_p8 = pneg %p1328_p7 }
 0x7d5   : > { %p1335_p13 = por %p1334_p12, %p1333_p11 }
 0x7d7   : > { %p1336_p0 = pnand %p1335_p13, %p1329_p8 }
 0x7d9   : > { %1339 = shalt.err (!%p1336_p0)
}
 0x7da   : > { %s1382_s15 = smov 128   ;;  %s1383_s16 = smov 8  }
 0x7db   : > { %1226 = dma.vmem_to_hbm [thread:$0]  (%p1462_p5), %s1788_s14, 256, %s1793_s17, %s1797_s28, %s1382_s15, %s1382_s15, %s1383_s16  }
 0x7dc PF: > { %p1232_p1 = scmp.ge.s32.totalorder %s1374_s27, 2  ;;  %s1063_s18 = sand.u32 1, %s1362_s24  }
 0x7dd   : > { %s1064_s19 = scalar_lea.sflag [#allocation3], %s1063_s18 }
 0x7de   : > { %p1229_p2 = pnand %p1232_p1, %p1466_p6 }
 0x7e0   : > { %1357 = dma.done.wait (!%p1229_p2), %s1064_s19, 256  }
 0x7e1   : > { %1359 = vsyncadd (!%p1229_p2), %s1064_s19, 4294967040  ;;  %p17_p3 = scmp.ge.s32.totalorder %s1449_s30, 4   ;;  %s1864_s24 = smov %s1366_s25 }
 0x7e2   : > { %s1865_s25 = smov %s1370_s26  ;;  %s1866_s26 = smov %s1460_s10 }
 0x7e3   : > { %s1867_s27 = smov %s1449_s30  ;;  %19 = sbr.rel (!%p17_p3) target bundleno = 3 (0x3), region = 83 }
 0x7ea   :  { %1069 = vsyncpa [#allocation3], 1 }
 0x7eb   :  { %1071 = vsyncpa [#allocation3 + $0x1], 1 }

</bundles_post_ra>
